<compile_context>
chip_gen: v7x
topology: tpu7x:2x2x1
jax: 0.10.0
libtpu: 0.0.40
codegen_flags: <defaults>
</compile_context>

<pallas_src>
import numpy as np
import jax
import jax.numpy as jnp
from jax.experimental import pallas as pl
from jax.experimental.pallas import tpu as pltpu

EPS = 1e-5    # torch BatchNorm1d default eps
LANE = 128    # TPU lane width
SUB = 16      # bf16 sublane packing


def _round_up(n, m):
    return ((n + m - 1) // m) * m


# ----------------------------------------------------------------------------
# Pallas kernel: 5 dense layers (mask + BN already folded into w/b on host).
# One grid axis over batch rows; weights are resident (constant index_map).
# Matmuls run bf16 x bf16 -> f32 accumulate; bias-add / ReLU in f32.
# ----------------------------------------------------------------------------
def _enrich_kernel(x_ref,
                   w1_ref, b1_ref, w2_ref, b2_ref, w3_ref, b3_ref,
                   w4_ref, b4_ref, w5_ref, b5_ref,
                   out_ref):
    def layer(h_bf16, w_ref, b_ref):
        y = jnp.dot(h_bf16, w_ref[...], preferred_element_type=jnp.float32)
        return y + b_ref[...]

    h = x_ref[...]                                                      # bf16
    h = jnp.maximum(layer(h, w1_ref, b1_ref), 0.0).astype(jnp.bfloat16)  # ML1+BN1+ReLU
    h = jnp.maximum(layer(h, w2_ref, b2_ref), 0.0).astype(jnp.bfloat16)  # ML2+BN2+ReLU
    h = jnp.maximum(layer(h, w3_ref, b3_ref), 0.0).astype(jnp.bfloat16)  # ML3+BN3+ReLU
    h = jnp.maximum(layer(h, w4_ref, b4_ref), 0.0).astype(jnp.bfloat16)  # final ML+ReLU
    out_ref[...] = layer(h, w5_ref, b5_ref).astype(out_ref.dtype)        # classify


def enrich_classifier_forward(x, folded_params, n_labels, *, block_rows=1024):
    """x: (batch, in_f).  folded_params: [w1(bf16), b1(f32), ..., w5, b5]."""
    batch, in_f = x.shape
    in_p = folded_params[0].shape[0]       # round_up(in_f, 16)
    out_pad = folded_params[-2].shape[1]   # round_up(n_labels, 128)

    # Rows: pad only to a multiple of 16 (cheap / often a no-op), never to br.
    rows = _round_up(batch, SUB)
    xb = x.astype(jnp.bfloat16)
    if (rows, in_p) != (batch, in_f):
        xb = jnp.zeros((rows, in_p), jnp.bfloat16).at[:batch, :in_f].set(xb)

    # Row tile: large (amortize ~0.35us/step), multiple of 16, but capped so the
    # "parallel" batch grid keeps >=4 steps for v7x 2-TC sharding on big batches.
    br = min(block_rows, max(SUB, _round_up(pl.cdiv(rows, 4), SUB)))
    grid = (pl.cdiv(rows, br),)            # ragged last block is fine (rows >= 16)

    # Honest-ish advisory cost: actual kernel matmul shapes + bf16 traffic.
    flops = 2 * rows * sum(int(w.shape[0]) * int(w.shape[1])
                           for w in folded_params[0::2])
    param_bytes = sum(int(np.prod(p.shape)) * p.dtype.itemsize
                      for p in folded_params)
    bytes_accessed = rows * (in_p + out_pad) * 2 + param_bytes

    in_specs = [pl.BlockSpec((br, in_p), lambda i: (i, 0))]            # row-tiled x
    in_specs += [pl.BlockSpec(p.shape, lambda i: (0, 0))               # resident params
                 for p in folded_params]

    out_p = pl.pallas_call(
        _enrich_kernel,
        out_shape=jax.ShapeDtypeStruct((rows, out_pad), jnp.bfloat16),
        grid_spec=pltpu.PrefetchScalarGridSpec(
            num_scalar_prefetch=0,
            grid=grid,
            in_specs=in_specs,
            out_specs=pl.BlockSpec((br, out_pad), lambda i: (i, 0)),
        ),
        compiler_params=pltpu.CompilerParams(
            dimension_semantics=("parallel",),
            vmem_limit_bytes=32 * 1024 * 1024,
        ),
        cost_estimate=pl.CostEstimate(flops=flops, transcendentals=0,
                                      bytes_accessed=bytes_accessed),
    )(xb, *folded_params)

    return out_p[:batch, :n_labels].astype(jnp.float32)


# ----------------------------------------------------------------------------
# Host-side folding + padding of the raw module parameters.
# ----------------------------------------------------------------------------
def fold_and_pad(params):
    (w1, m1, b1, g1, be1, mu1, v1,
     w2, m2, b2, g2, be2, mu2, v2,
     w3, m3, b3, g3, be3, mu3, v3,
     w4, m4, b4, w5, b5) = params

    def fold_bn(w, m, b, g, be, mu, v):
        scale = g / jnp.sqrt(v + EPS)                       # (1, out)
        w_fold = (w * m) * scale.reshape(-1, 1)             # (out, in)
        b_fold = (b - mu) * scale + be                      # (1, out)
        return w_fold, b_fold

    def pad_wb(w_oi, b, in_align):
        # Weight stored transposed (in, out) so the kernel does h @ w directly.
        # in dim padded to `in_align` (16 for layer 1, 128 for the rest so it
        # matches the previous layer's 128-padded output); out dim padded to
        # 128 for lane-dense MXU tiles / unmasked vst.  Zeros stay inert
        # through matmul, bias-add and ReLU.  Weights cast to bf16; bias f32.
        wt = jnp.asarray(w_oi, jnp.float32).T
        in_f, out_f = wt.shape
        in_p, out_p = _round_up(in_f, in_align), _round_up(out_f, LANE)
        w_p = jnp.zeros((in_p, out_p), jnp.float32).at[:in_f, :out_f].set(wt)
        b_p = jnp.zeros((1, out_p), jnp.float32).at[:, :out_f].set(
            jnp.asarray(b, jnp.float32).reshape(1, -1))
        return [w_p.astype(jnp.bfloat16), b_p]

    folded = []
    folded += pad_wb(*fold_bn(w1, m1, b1, g1, be1, mu1, v1), in_align=SUB)
    folded += pad_wb(*fold_bn(w2, m2, b2, g2, be2, mu2, v2), in_align=LANE)
    folded += pad_wb(*fold_bn(w3, m3, b3, g3, be3, mu3, v3), in_align=LANE)
    folded += pad_wb(w4 * m4, b4, in_align=LANE)     # final MaskedLinear (no BN)
    folded += pad_wb(w5, b5, in_align=LANE)          # classify
    return folded


# ----------------------------------------------------------------------------
# Mask construction (mirrors EnrichClassifier.__init__) — plain numpy glue.
# ----------------------------------------------------------------------------
def _block_diag_ones(sizes):
    sizes = [int(s) for s in sizes]
    m = np.zeros((sum(sizes), len(sizes)), dtype=np.float32)
    off = 0
    for j, s in enumerate(sizes):
        m[off:off + s, j] = 1.0
        off += s
    return m


def build_masks(pathways_mask, divide_nodes=(5, 2, 2), min_nodes=(4, 3, 2)):
    pm = np.asarray(pathways_mask, dtype=np.float32)
    l1_sizes = pm.sum(0).astype(np.int64) // divide_nodes[0]
    l1_sizes = np.maximum(l1_sizes, min_nodes[0])
    l1_mask = np.repeat(pm, l1_sizes, axis=1)

    l2_sizes = np.maximum(l1_sizes // divide_nodes[1], min_nodes[1])
    l2_mask = np.repeat(_block_diag_ones(l1_sizes), l2_sizes, axis=1)

    l3_sizes = np.maximum(l2_sizes // divide_nodes[2], min_nodes[2])
    l3_mask = np.repeat(_block_diag_ones(l2_sizes), l3_sizes, axis=1)

    final_mask = _block_diag_ones(l3_sizes)
    return l1_mask, l2_mask, l3_mask, final_mask


# ----------------------------------------------------------------------------
# Deterministic parameter initialization (shapes per the module's __init__).
# ----------------------------------------------------------------------------
def init_params(key, masks, n_labels):
    l1_mask, l2_mask, l3_mask, final_mask = masks

    def linear_init(k, in_f, out_f):
        kw, kb = jax.random.split(k)
        bound = 1.0 / np.sqrt(in_f)
        w = jax.random.uniform(kw, (out_f, in_f), jnp.float32, -bound, bound)
        b = jax.random.uniform(kb, (1, out_f), jnp.float32, -bound, bound)
        return w, b

    def bn_init(k, f):
        k1, k2 = jax.random.split(k)
        gamma = jnp.ones((1, f), jnp.float32)
        beta = jnp.zeros((1, f), jnp.float32)
        mean = 0.05 * jax.random.normal(k1, (1, f), jnp.float32)
        var = 1.0 + 0.1 * jax.random.uniform(k2, (1, f), jnp.float32)
        return gamma, beta, mean, var

    keys = jax.random.split(key, 8)
    params = []
    for mask, kl, kb in [(l1_mask, keys[0], keys[1]),
                         (l2_mask, keys[2], keys[3]),
                         (l3_mask, keys[4], keys[5])]:
        in_f, out_f = mask.shape
        w, b = linear_init(kl, in_f, out_f)
        g, be, mu, v = bn_init(kb, out_f)
        m_t = jnp.asarray(mask.T, jnp.float32)             # stored transposed (out, in)
        params += [w, m_t, b, g, be, mu, v]

    in_f, out_f = final_mask.shape
    w4, b4 = linear_init(keys[6], in_f, out_f)
    params += [w4, jnp.asarray(final_mask.T, jnp.float32), b4]

    w5, b5 = linear_init(keys[7], final_mask.shape[1], n_labels)
    params += [w5, b5]
    return params


# ----------------------------------------------------------------------------
# References.
# ----------------------------------------------------------------------------
def reference_forward(x, params):
    """Pure-JAX f32 reference on the raw (unfolded, unpadded) params."""
    (w1, m1, b1, g1, be1, mu1, v1,
     w2, m2, b2, g2, be2, mu2, v2,
     w3, m3, b3, g3, be3, mu3, v3,
     w4, m4, b4, w5, b5) = params

    def std(h, w, m, b, g, be, mu, v):
        y = h @ (w * m).T + b
        y = (y - mu) / jnp.sqrt(v + EPS) * g + be
        return jnp.maximum(y, 0.0)

    h = std(x, w1, m1, b1, g1, be1, mu1, v1)
    h = std(h, w2, m2, b2, g2, be2, mu2, v2)
    h = std(h, w3, m3, b3, g3, be3, mu3, v3)
    scores = jnp.maximum(h @ (w4 * m4).T + b4, 0.0)
    return scores @ w5.T + b5


def reference_forward_folded(x, folded, n_labels):
    """Pure-JAX reference that mirrors the kernel's bf16/f32 numerics exactly."""
    in_f = x.shape[1]
    in_p = folded[0].shape[0]
    h = jnp.zeros((x.shape[0], in_p), jnp.bfloat16).at[:, :in_f].set(
        x.astype(jnp.bfloat16))
    ws, bs = folded[0::2], folded[1::2]
    for w, b in zip(ws[:-1], bs[:-1]):
        y = jnp.dot(h, w, preferred_element_type=jnp.float32) + b
        h = jnp.maximum(y, 0.0).astype(jnp.bfloat16)
    y = jnp.dot(h, ws[-1], preferred_element_type=jnp.float32) + bs[-1]
    return y.astype(jnp.bfloat16)[:, :n_labels].astype(jnp.float32)


if __name__ == "__main__":
    # Deterministic synthetic pathways mask: 16 genes x 4 pathways, overlapping blocks.
    n_genes, n_pathways, n_labels, batch = 16, 4, 3, 2
    pathways_mask = np.zeros((n_genes, n_pathways), dtype=np.float32)
    for j in range(n_pathways):
        pathways_mask[3 * j: min(n_genes, 3 * j + 10), j] = 1.0

    masks = build_masks(pathways_mask)             # L1=16, L2=12, L3=8, final=(8,4)

    key = jax.random.PRNGKey(0)
    kx, kp = jax.random.split(key)
    params = init_params(kp, masks, n_labels)
    folded = fold_and_pad(params)                  # mask+BN folded, bf16 weights
    x = jax.random.normal(kx, (batch, n_genes), jnp.float32)

    out = enrich_classifier_forward(x, folded, n_labels)
    out = jax.block_until_ready(out)
    assert out.shape == (batch, n_labels)

    # Tight check vs. a pure-JAX path with identical bf16/f32 numerics
    # (validates pallas_call plumbing, tiling, padding inertness).
    ref_bf16 = reference_forward_folded(x, folded, n_labels)
    np.testing.assert_allclose(np.asarray(out), np.asarray(ref_bf16),
                               rtol=1e-2, atol=1e-2)

    # Loose check vs. the original f32 module math (validates mask/BN folding;
    # tolerance accounts for the bf16 weight/activation quantization).
    ref_f32 = reference_forward(x, params)
    np.testing.assert_allclose(np.asarray(out), np.asarray(ref_f32),
                               rtol=5e-2, atol=5e-2)

    print("KERNEL_OK")
</pallas_src>

<mosaic_0001>
module attributes {stable_mosaic.version = 11 : i64} {
  func.func @_enrich_kernel(%arg0: i32, %arg1: memref<16x16xbf16, #tpu.memory_space<vmem>>, %arg2: memref<16x128xbf16, #tpu.memory_space<vmem>>, %arg3: memref<1x128xf32, #tpu.memory_space<vmem>>, %arg4: memref<128x128xbf16, #tpu.memory_space<vmem>>, %arg5: memref<1x128xf32, #tpu.memory_space<vmem>>, %arg6: memref<128x128xbf16, #tpu.memory_space<vmem>>, %arg7: memref<1x128xf32, #tpu.memory_space<vmem>>, %arg8: memref<128x128xbf16, #tpu.memory_space<vmem>>, %arg9: memref<1x128xf32, #tpu.memory_space<vmem>>, %arg10: memref<128x128xbf16, #tpu.memory_space<vmem>>, %arg11: memref<1x128xf32, #tpu.memory_space<vmem>>, %arg12: memref<16x128xbf16, #tpu.memory_space<vmem>>) attributes {dimension_semantics = [#tpu.dimension_semantics<parallel>], iteration_bounds = array<i64: 1>, scalar_prefetch = 0 : i64, scratch_operands = 0 : i64, tpu.core_type = #tpu.core_type<tc>, window_params = [{transform_indices = @transform_0, window_bounds = array<i64: 16, 16>}, {pipeline_mode = #tpu.pipeline_mode<synchronous>, transform_indices = @transform_1, window_bounds = array<i64: 16, 128>}, {pipeline_mode = #tpu.pipeline_mode<synchronous>, transform_indices = @transform_2, window_bounds = array<i64: 1, 128>}, {pipeline_mode = #tpu.pipeline_mode<synchronous>, transform_indices = @transform_3, window_bounds = array<i64: 128, 128>}, {pipeline_mode = #tpu.pipeline_mode<synchronous>, transform_indices = @transform_4, window_bounds = array<i64: 1, 128>}, {pipeline_mode = #tpu.pipeline_mode<synchronous>, transform_indices = @transform_5, window_bounds = array<i64: 128, 128>}, {pipeline_mode = #tpu.pipeline_mode<synchronous>, transform_indices = @transform_6, window_bounds = array<i64: 1, 128>}, {pipeline_mode = #tpu.pipeline_mode<synchronous>, transform_indices = @transform_7, window_bounds = array<i64: 128, 128>}, {pipeline_mode = #tpu.pipeline_mode<synchronous>, transform_indices = @transform_8, window_bounds = array<i64: 1, 128>}, {pipeline_mode = #tpu.pipeline_mode<synchronous>, transform_indices = @transform_9, window_bounds = array<i64: 128, 128>}, {pipeline_mode = #tpu.pipeline_mode<synchronous>, transform_indices = @transform_10, window_bounds = array<i64: 1, 128>}, {transform_indices = @transform_11, window_bounds = array<i64: 16, 128>}]} {
    %c0 = arith.constant 0 : index
    %c0_0 = arith.constant 0 : index
    %0 = vector.load %arg1[%c0, %c0_0] : memref<16x16xbf16, #tpu.memory_space<vmem>>, vector<16x16xbf16>
    %c0_1 = arith.constant 0 : index
    %c0_2 = arith.constant 0 : index
    %1 = vector.load %arg2[%c0_1, %c0_2] : memref<16x128xbf16, #tpu.memory_space<vmem>>, vector<16x128xbf16>
    %cst = arith.constant dense<0.000000e+00> : vector<16x128xf32>
    %2 = tpu.matmul %0, %1, %cst {dimension_numbers = #tpu.dot_dimension_numbers<[1], [0], [0], [1], [0, 0, 1, 1], [], []>} : vector<16x16xbf16>, vector<16x128xbf16>, vector<16x128xf32> -> vector<16x128xf32>
    %c0_3 = arith.constant 0 : index
    %c0_4 = arith.constant 0 : index
    %3 = vector.load %arg3[%c0_3, %c0_4] : memref<1x128xf32, #tpu.memory_space<vmem>>, vector<1x128xf32>
    %4 = vector.broadcast %3 : vector<1x128xf32> to vector<16x128xf32>
    %5 = arith.addf %2, %4 : vector<16x128xf32>
    %cst_5 = arith.constant 0.000000e+00 : f32
    %6 = vector.broadcast %cst_5 : f32 to vector<16x128xf32>
    %7 = arith.maximumf %5, %6 : vector<16x128xf32>
    %8 = arith.truncf %7 : vector<16x128xf32> to vector<16x128xbf16>
    %c0_6 = arith.constant 0 : index
    %c0_7 = arith.constant 0 : index
    %9 = vector.load %arg4[%c0_6, %c0_7] : memref<128x128xbf16, #tpu.memory_space<vmem>>, vector<128x128xbf16>
    %cst_8 = arith.constant dense<0.000000e+00> : vector<16x128xf32>
    %10 = tpu.matmul %8, %9, %cst_8 {dimension_numbers = #tpu.dot_dimension_numbers<[1], [0], [0], [1], [0, 0, 1, 1], [], []>} : vector<16x128xbf16>, vector<128x128xbf16>, vector<16x128xf32> -> vector<16x128xf32>
    %c0_9 = arith.constant 0 : index
    %c0_10 = arith.constant 0 : index
    %11 = vector.load %arg5[%c0_9, %c0_10] : memref<1x128xf32, #tpu.memory_space<vmem>>, vector<1x128xf32>
    %12 = vector.broadcast %11 : vector<1x128xf32> to vector<16x128xf32>
    %13 = arith.addf %10, %12 : vector<16x128xf32>
    %cst_11 = arith.constant 0.000000e+00 : f32
    %14 = vector.broadcast %cst_11 : f32 to vector<16x128xf32>
    %15 = arith.maximumf %13, %14 : vector<16x128xf32>
    %16 = arith.truncf %15 : vector<16x128xf32> to vector<16x128xbf16>
    %c0_12 = arith.constant 0 : index
    %c0_13 = arith.constant 0 : index
    %17 = vector.load %arg6[%c0_12, %c0_13] : memref<128x128xbf16, #tpu.memory_space<vmem>>, vector<128x128xbf16>
    %cst_14 = arith.constant dense<0.000000e+00> : vector<16x128xf32>
    %18 = tpu.matmul %16, %17, %cst_14 {dimension_numbers = #tpu.dot_dimension_numbers<[1], [0], [0], [1], [0, 0, 1, 1], [], []>} : vector<16x128xbf16>, vector<128x128xbf16>, vector<16x128xf32> -> vector<16x128xf32>
    %c0_15 = arith.constant 0 : index
    %c0_16 = arith.constant 0 : index
    %19 = vector.load %arg7[%c0_15, %c0_16] : memref<1x128xf32, #tpu.memory_space<vmem>>, vector<1x128xf32>
    %20 = vector.broadcast %19 : vector<1x128xf32> to vector<16x128xf32>
    %21 = arith.addf %18, %20 : vector<16x128xf32>
    %cst_17 = arith.constant 0.000000e+00 : f32
    %22 = vector.broadcast %cst_17 : f32 to vector<16x128xf32>
    %23 = arith.maximumf %21, %22 : vector<16x128xf32>
    %24 = arith.truncf %23 : vector<16x128xf32> to vector<16x128xbf16>
    %c0_18 = arith.constant 0 : index
    %c0_19 = arith.constant 0 : index
    %25 = vector.load %arg8[%c0_18, %c0_19] : memref<128x128xbf16, #tpu.memory_space<vmem>>, vector<128x128xbf16>
    %cst_20 = arith.constant dense<0.000000e+00> : vector<16x128xf32>
    %26 = tpu.matmul %24, %25, %cst_20 {dimension_numbers = #tpu.dot_dimension_numbers<[1], [0], [0], [1], [0, 0, 1, 1], [], []>} : vector<16x128xbf16>, vector<128x128xbf16>, vector<16x128xf32> -> vector<16x128xf32>
    %c0_21 = arith.constant 0 : index
    %c0_22 = arith.constant 0 : index
    %27 = vector.load %arg9[%c0_21, %c0_22] : memref<1x128xf32, #tpu.memory_space<vmem>>, vector<1x128xf32>
    %28 = vector.broadcast %27 : vector<1x128xf32> to vector<16x128xf32>
    %29 = arith.addf %26, %28 : vector<16x128xf32>
    %cst_23 = arith.constant 0.000000e+00 : f32
    %30 = vector.broadcast %cst_23 : f32 to vector<16x128xf32>
    %31 = arith.maximumf %29, %30 : vector<16x128xf32>
    %32 = arith.truncf %31 : vector<16x128xf32> to vector<16x128xbf16>
    %c0_24 = arith.constant 0 : index
    %c0_25 = arith.constant 0 : index
    %33 = vector.load %arg10[%c0_24, %c0_25] : memref<128x128xbf16, #tpu.memory_space<vmem>>, vector<128x128xbf16>
    %cst_26 = arith.constant dense<0.000000e+00> : vector<16x128xf32>
    %34 = tpu.matmul %32, %33, %cst_26 {dimension_numbers = #tpu.dot_dimension_numbers<[1], [0], [0], [1], [0, 0, 1, 1], [], []>} : vector<16x128xbf16>, vector<128x128xbf16>, vector<16x128xf32> -> vector<16x128xf32>
    %c0_27 = arith.constant 0 : index
    %c0_28 = arith.constant 0 : index
    %35 = vector.load %arg11[%c0_27, %c0_28] : memref<1x128xf32, #tpu.memory_space<vmem>>, vector<1x128xf32>
    %36 = vector.broadcast %35 : vector<1x128xf32> to vector<16x128xf32>
    %37 = arith.addf %34, %36 : vector<16x128xf32>
    %38 = arith.truncf %37 : vector<16x128xf32> to vector<16x128xbf16>
    %c0_29 = arith.constant 0 : index
    %c0_30 = arith.constant 0 : index
    %39 = vector.load %arg12[%c0_29, %c0_30] : memref<16x128xbf16, #tpu.memory_space<vmem>>, vector<16x128xbf16>
    tpu.vector_store %arg12[%c0_29, %c0_30], %38 {strides = array<i32>} : memref<16x128xbf16, #tpu.memory_space<vmem>>, vector<16x128xbf16>,
    return
  }
  func.func @transform_0(%arg0: i32) -> (i32, i32) {
    %c0_i32 = arith.constant 0 : i32
    %c0_i32_0 = arith.constant 0 : i32
    return %arg0, %c0_i32 : i32, i32
  }
  func.func @transform_1(%arg0: i32) -> (i32, i32) {
    %c0_i32 = arith.constant 0 : i32
    %c0_i32_0 = arith.constant 0 : i32
    %c0_i32_1 = arith.constant 0 : i32
    return %c0_i32, %c0_i32_0 : i32, i32
  }
  func.func @transform_2(%arg0: i32) -> (i32, i32) {
    %c0_i32 = arith.constant 0 : i32
    %c0_i32_0 = arith.constant 0 : i32
    %c0_i32_1 = arith.constant 0 : i32
    return %c0_i32, %c0_i32_0 : i32, i32
  }
  func.func @transform_3(%arg0: i32) -> (i32, i32) {
    %c0_i32 = arith.constant 0 : i32
    %c0_i32_0 = arith.constant 0 : i32
    %c0_i32_1 = arith.constant 0 : i32
    return %c0_i32, %c0_i32_0 : i32, i32
  }
  func.func @transform_4(%arg0: i32) -> (i32, i32) {
    %c0_i32 = arith.constant 0 : i32
    %c0_i32_0 = arith.constant 0 : i32
    %c0_i32_1 = arith.constant 0 : i32
    return %c0_i32, %c0_i32_0 : i32, i32
  }
  func.func @transform_5(%arg0: i32) -> (i32, i32) {
    %c0_i32 = arith.constant 0 : i32
    %c0_i32_0 = arith.constant 0 : i32
    %c0_i32_1 = arith.constant 0 : i32
    return %c0_i32, %c0_i32_0 : i32, i32
  }
  func.func @transform_6(%arg0: i32) -> (i32, i32) {
    %c0_i32 = arith.constant 0 : i32
    %c0_i32_0 = arith.constant 0 : i32
    %c0_i32_1 = arith.constant 0 : i32
    return %c0_i32, %c0_i32_0 : i32, i32
  }
  func.func @transform_7(%arg0: i32) -> (i32, i32) {
    %c0_i32 = arith.constant 0 : i32
    %c0_i32_0 = arith.constant 0 : i32
    %c0_i32_1 = arith.constant 0 : i32
    return %c0_i32, %c0_i32_0 : i32, i32
  }
  func.func @transform_8(%arg0: i32) -> (i32, i32) {
    %c0_i32 = arith.constant 0 : i32
    %c0_i32_0 = arith.constant 0 : i32
    %c0_i32_1 = arith.constant 0 : i32
    return %c0_i32, %c0_i32_0 : i32, i32
  }
  func.func @transform_9(%arg0: i32) -> (i32, i32) {
    %c0_i32 = arith.constant 0 : i32
    %c0_i32_0 = arith.constant 0 : i32
    %c0_i32_1 = arith.constant 0 : i32
    return %c0_i32, %c0_i32_0 : i32, i32
  }
  func.func @transform_10(%arg0: i32) -> (i32, i32) {
    %c0_i32 = arith.constant 0 : i32
    %c0_i32_0 = arith.constant 0 : i32
    %c0_i32_1 = arith.constant 0 : i32
    return %c0_i32, %c0_i32_0 : i32, i32
  }
  func.func @transform_11(%arg0: i32) -> (i32, i32) {
    %c0_i32 = arith.constant 0 : i32
    %c0_i32_0 = arith.constant 0 : i32
    return %arg0, %c0_i32 : i32, i32
  }
}

</mosaic_0001>

<bundles_post_ra>
// kernel: tpu_custom_call.1
= control target key start
LH: loop header
LB: loop body
LE: loop exit
PB: predicated region body
PF: predicated region fallthrough
CT: control target
= control target key end

     0   :  { %16 = vsyncpa [#allocation3], 0  ;;  %s1316_s0 = inlined_call_operand.hbm [shape: bf16[16,16], index: 0, kind: input, shape index: {}]   ;;  %s1317_s1 = inlined_call_operand.hbm [shape: bf16[16,128], index: 1, kind: input, shape index: {}]   ;;  %s1318_s2 = inlined_call_operand.vmem [shape: f32[1,128], index: 2, kind: input, shape index: {}]   ;;  %s1319_s3 = inlined_call_operand.hbm [shape: bf16[128,128], index: 3, kind: input, shape index: {}]   ;;  %s1320_s4 = inlined_call_operand.vmem [shape: f32[1,128], index: 4, kind: input, shape index: {}]   ;;  %s1321_s5 = inlined_call_operand.hbm [shape: bf16[128,128], index: 5, kind: input, shape index: {}]   ;;  %s1322_s6 = inlined_call_operand.vmem [shape: f32[1,128], index: 6, kind: input, shape index: {}]   ;;  %s1323_s7 = inlined_call_operand.hbm [shape: bf16[128,128], index: 7, kind: input, shape index: {}]   ;;  %s1324_s8 = inlined_call_operand.vmem [shape: f32[1,128], index: 8, kind: input, shape index: {}]   ;;  %s1325_s9 = inlined_call_operand.hbm [shape: bf16[128,128], index: 9, kind: input, shape index: {}]   ;;  %s1326_s10 = inlined_call_operand.vmem [shape: f32[1,128], index: 10, kind: input, shape index: {}]   ;;  %s1327_s11 = inlined_call_operand.hbm [shape: bf16[16,128], index: 11, kind: output, shape index: {}]  }
   0x1   :  { %17 = vsyncpa [#allocation6], 0 }
   0x2   :  { %18 = vsyncpa [#allocation9], 0 }
   0x3   :  { %19 = vsyncpa [#allocation12], 0 }
   0x4   :  { %20 = vsyncpa [#allocation4], 0  ;;  %s1061_s17 = smov [#allocation5]   ;;  %s1062_s19 = smov [#allocation8]  }
   0x5   :  { %s38_s18 = sshll.u32 %s1061_s17, 4  ;;  %s66_s20 = sshll.u32 %s1062_s19, 4  ;;  %s39_s18 = int_to_ptr.vmem [resolvable:$true] %s38_s18  ;;  %s1132_s20 = int_to_ptr.vmem [resolvable:$true] %s66_s20 }
   0x6   :  { %s897_s23 = scalar_lea.hbm %s1317_s1, 128 }
   0x7   :  { %p898_p0 = scmp.ne.s32.totalorder %s1317_s1, %s897_s23  ;;  %p901_p1 = scmp.lt.u32.totalorder %s897_s23, %s1317_s1 }
   0x9   :  { %p903_p2 = pnand %p901_p1, %p898_p0 }
   0xb   :  { %906 = shalt.err (!%p903_p2)
}
   0xc   :  { %s907_s28 = scalar_lea.vmem %s39_s18, 128  ;;  %p912_p4 = scmp.lt.s32.totalorder %s39_s18, %s39_s18 }
   0xd   :  { %p908_p3 = scmp.ne.s32.totalorder %s39_s18, %s907_s28  ;;  %p913_p5 = scmp.lt.s32.totalorder %s907_s28, %s907_s28 }
   0xf   :  { %p914_p6 = por %p913_p5, %p912_p4 }
  0x11   :  { %p915_p7 = pnand %p914_p6, %p908_p3 }
  0x13   :  { %918 = shalt.err (!%p915_p7)
}
  0x14   :  { %s1063_s29 = smov 64   ;;  %s1064_s30 = smov 4  }
  0x15   :  { %44 = dma.hbm_to_vmem [thread:$0]  %s1317_s1, 128, %s39_s18, [#allocation6], %s1063_s29, %s1063_s29, %s1064_s30  }
  0x16   :  { %s919_s16 = scalar_lea.hbm %s1321_s5, 1024 }
  0x17   :  { %p920_p8 = scmp.ne.s32.totalorder %s1321_s5, %s919_s16  ;;  %p923_p9 = scmp.lt.u32.totalorder %s919_s16, %s1321_s5 }
  0x19   :  { %p925_p10 = pnand %p923_p9, %p920_p8 }
  0x1b   :  { %928 = shalt.err (!%p925_p10)
}
  0x1c   :  { %s929_s23 = scalar_lea.vmem %s1132_s20, 1024  ;;  %p934_p12 = scmp.lt.s32.totalorder %s1132_s20, %s1132_s20 }
  0x1d   :  { %p930_p11 = scmp.ne.s32.totalorder %s1132_s20, %s929_s23  ;;  %p935_p13 = scmp.lt.s32.totalorder %s929_s23, %s929_s23 }
  0x1f   :  { %p936_p0 = por %p935_p13, %p934_p12 }
  0x21   :  { %p937_p1 = pnand %p936_p0, %p930_p11 }
  0x23   :  { %940 = shalt.err (!%p937_p1)
}
  0x24   :  { %72 = dma.hbm_to_vmem [thread:$0]  %s1321_s5, 1024, %s1132_s20, [#allocation9], %s1063_s29, %s1063_s29, %s1064_s30  }
  0x25   :  { %s1065_s24 = smov [#allocation2]   ;;  %s1066_s26 = smov [#allocation7]  }
  0x26   :  { %s26_s25 = sshll.u32 %s1065_s24, 4  ;;  %s52_s27 = sshll.u32 %s1066_s26, 4  ;;  %s27_s25 = int_to_ptr.vmem [resolvable:$true] %s26_s25  ;;  %s1169_s27 = int_to_ptr.vmem [resolvable:$true] %s52_s27 }
  0x27   :  { %s941_s13 = scalar_lea.hbm %s1316_s0, 128 }
  0x28   :  { %p942_p2 = scmp.ne.s32.totalorder %s1316_s0, %s941_s13  ;;  %p945_p3 = scmp.lt.u32.totalorder %s941_s13, %s1316_s0 }
  0x2a   :  { %p947_p4 = pnand %p945_p3, %p942_p2 }
  0x2c   :  { %950 = shalt.err (!%p947_p4)
}
  0x2d   :  { %s951_s5 = scalar_lea.vmem %s27_s25, 128  ;;  %p956_p6 = scmp.lt.s32.totalorder %s27_s25, %s27_s25 }
  0x2e   :  { %p952_p5 = scmp.ne.s32.totalorder %s27_s25, %s951_s5  ;;  %p957_p7 = scmp.lt.s32.totalorder %s951_s5, %s951_s5 }
  0x30   :  { %p958_p8 = por %p957_p7, %p956_p6 }
  0x32   :  { %p959_p9 = pnand %p958_p8, %p952_p5 }
  0x34   :  { %962 = shalt.err (!%p959_p9)
}
  0x35   :  { %32 = dma.hbm_to_vmem [thread:$0]  %s1316_s0, 128, %s27_s25, [#allocation3], %s1063_s29, %s1063_s29, %s1064_s30  }
  0x36   :  { %s963_s23 = scalar_lea.hbm %s1319_s3, 1024 }
  0x37   :  { %p964_p10 = scmp.ne.s32.totalorder %s1319_s3, %s963_s23  ;;  %p967_p11 = scmp.lt.u32.totalorder %s963_s23, %s1319_s3 }
  0x39   :  { %p969_p12 = pnand %p967_p11, %p964_p10 }
  0x3b   :  { %972 = shalt.err (!%p969_p12)
}
  0x3c   :  { %s973_s28 = scalar_lea.vmem %s1169_s27, 1024  ;;  %p978_p0 = scmp.lt.s32.totalorder %s1169_s27, %s1169_s27 }
  0x3d   :  { %p974_p13 = scmp.ne.s32.totalorder %s1169_s27, %s973_s28  ;;  %p979_p1 = scmp.lt.s32.totalorder %s973_s28, %s973_s28 }
  0x3f   :  { %p980_p2 = por %p979_p1, %p978_p0 }
  0x41   :  { %p981_p3 = pnand %p980_p2, %p974_p13 }
  0x43   :  { %984 = shalt.err (!%p981_p3)
}
  0x44   :  { %58 = dma.hbm_to_vmem [thread:$0]  %s1319_s3, 1024, %s1169_s27, [#allocation6], %s1063_s29, %s1063_s29, %s1064_s30  }
  0x45   :  { %s1067_s12 = smov [#allocation10]   ;;  %s1068_s14 = smov [#allocation11]  }
  0x46   :  { %s80_s13 = sshll.u32 %s1067_s12, 4  ;;  %s94_s15 = sshll.u32 %s1068_s14, 4  ;;  %s81_s13 = int_to_ptr.vmem [resolvable:$true] %s80_s13  ;;  %s1206_s15 = int_to_ptr.vmem [resolvable:$true] %s94_s15 }
  0x47   :  { %s985_s5 = scalar_lea.hbm %s1323_s7, 1024 }
  0x48   :  { %p986_p4 = scmp.ne.s32.totalorder %s1323_s7, %s985_s5  ;;  %p989_p5 = scmp.lt.u32.totalorder %s985_s5, %s1323_s7 }
  0x4a   :  { %p991_p6 = pnand %p989_p5, %p986_p4 }
  0x4c   :  { %994 = shalt.err (!%p991_p6)
}
  0x4d   :  { %s995_s3 = scalar_lea.vmem %s81_s13, 1024  ;;  %p1000_p8 = scmp.lt.s32.totalorder %s81_s13, %s81_s13 }
  0x4e   :  { %p996_p7 = scmp.ne.s32.totalorder %s81_s13, %s995_s3  ;;  %p1001_p9 = scmp.lt.s32.totalorder %s995_s3, %s995_s3 }
  0x50   :  { %p1002_p10 = por %p1001_p9, %p1000_p8 }
  0x52   :  { %p1003_p11 = pnand %p1002_p10, %p996_p7 }
  0x54   :  { %1006 = shalt.err (!%p1003_p11)
}
  0x55   :  { %86 = dma.hbm_to_vmem [thread:$0]  %s1323_s7, 1024, %s81_s13, [#allocation9], %s1063_s29, %s1063_s29, %s1064_s30  }
  0x56   :  { %s1007_s24 = scalar_lea.hbm %s1325_s9, 1024 }
  0x57   :  { %p1008_p12 = scmp.ne.s32.totalorder %s1325_s9, %s1007_s24  ;;  %p1011_p13 = scmp.lt.u32.totalorder %s1007_s24, %s1325_s9 }
  0x59   :  { %p1013_p0 = pnand %p1011_p13, %p1008_p12 }
  0x5b   :  { %1016 = shalt.err (!%p1013_p0)
}
  0x5c   :  { %s1017_s12 = scalar_lea.vmem %s1206_s15, 1024  ;;  %p1022_p2 = scmp.lt.s32.totalorder %s1206_s15, %s1206_s15 }
  0x5d   :  { %p1018_p1 = scmp.ne.s32.totalorder %s1206_s15, %s1017_s12  ;;  %p1023_p3 = scmp.lt.s32.totalorder %s1017_s12, %s1017_s12 }
  0x5f   :  { %p1024_p4 = por %p1023_p3, %p1022_p2 }
  0x61   :  { %p1025_p5 = pnand %p1024_p4, %p1018_p1 }
  0x63   :  { %1028 = shalt.err (!%p1025_p5)
}
  0x64   :  { %100 = dma.hbm_to_vmem [thread:$0]  %s1325_s9, 1024, %s1206_s15, [#allocation12], %s1063_s29, %s1063_s29, %s1064_s30  }
  0x65   :  { %1051 = dma.done.wait [#allocation3], 128  }
  0x66   :  { %1052 = vsyncadd [#allocation3], 4294967168 }
  0x67   :  { %1053 = dma.done.wait [#allocation6], 1152  }
  0x68   :  { %1054 = vsyncadd [#allocation6], 4294966144 }
  0x69   :  { %1055 = dma.done.wait [#allocation9], 2048  }
  0x6a   :  { %1056 = vsyncadd [#allocation9], 4294965248 }
  0x6b   :  { %1057 = dma.done.wait [#allocation12], 1024  }
  0x6c   :  { %1058 = vsyncadd [#allocation12], 4294966272  ;;  %v1069_v0 = vmov 0.0   ;;  %vm1070_vm0 = vmmov 0   ;;  %v863_v1 = vld [vmem:[#allocation5] sm:$0xff]   ;;  %v864_v2 = vld [vmem:[#allocation2] sm:$0xff]  }
  0x6d   :  { %766 = vmatprep.subr.bf16.mxu0 %v1069_v0  ;;  %768 = vmatprep.mubr.msk.bf16.mxu0 %vm1070_vm0, %v1069_v0  ;;  %vm144_vm1 = vcmask 130048   ;;  %v865_v3 = vld [vmem:[#allocation7] sm:$0xff]   ;;  %v866_v4 = vld [vmem:[#allocation7 + $0x8] sm:$0xff]   ;;  %v867_v5 = vld [vmem:[#allocation7 + $0x10] sm:$0xff]   ;;  %s1071_s19 = smov [#allocation13]  }
  0x6e   :  { %772 = vmatprep.subr.bf16.mxu1 %v1069_v0  ;;  %788 = vmatprep.mubr.msk.bf16.mxu1 %vm1070_vm0, %v1069_v0  ;;  %v868_v6 = vld [vmem:[#allocation7 + $0x18] sm:$0xff]   ;;  %v869_v7 = vld [vmem:[#allocation7 + $0x20] sm:$0xff]   ;;  %v870_v8 = vld [vmem:[#allocation7 + $0x28] sm:$0xff]   ;;  %s664_s21 = sshll.u32 %s1071_s19, 4  ;;  %s665_s21 = int_to_ptr.vmem [resolvable:$true] %s664_s21 }
  0x6f   :  { %767 = vmatpush3.bf16.msra.mxu0 %v863_v1  ;;  %773 = vmatpush3.bf16.msra.mxu1 %v865_v3  ;;  %v871_v9 = vld [vmem:[#allocation7 + $0x30] sm:$0xff]   ;;  %v872_v10 = vld [vmem:[#allocation7 + $0x38] sm:$0xff]   ;;  %v873_v11 = vld [vmem:[#allocation8] sm:$0xff]   ;;  %p1034_p7 = scmp.lt.s32.totalorder %s665_s21, %s665_s21 }
  0x70   :  { %792 = vmatprep.subr.bf16.mxu0 %v1069_v0  ;;  %774 = vmatprep.subr.bf16.mxu1 %v1069_v0  ;;  %v874_v12 = vld [vmem:[#allocation8 + $0x8] sm:$0xff]   ;;  %v875_v13 = vld [vmem:[#allocation8 + $0x10] sm:$0xff]   ;;  %v876_v14 = vld [vmem:[#allocation8 + $0x18] sm:$0xff]  }
  0x71   :  { %v877_v15 = vld [vmem:[#allocation8 + $0x20] sm:$0xff]   ;;  %v878_v16 = vld [vmem:[#allocation8 + $0x28] sm:$0xff]   ;;  %v679_v17 = vld [vmem:[%s1318_s2] ss:$0 sm:$0xff] }
  0x72   :  { %769 = vmatmul.mubr.msk.bf16.vlgmr.msra.gmra.mrb[0].mxu0 %vm144_vm1, %v864_v2  ;;  %v879_v27 = vld [vmem:[#allocation8 + $0x30] sm:$0xff]   ;;  %v880_v28 = vld [vmem:[#allocation8 + $0x38] sm:$0xff]   ;;  %v881_v29 = vld [vmem:[#allocation10] sm:$0xff]  }
  0x73   :  { %808 = vmatprep.mubr.msk.bf16.mxu0 %vm1070_vm0, %v1069_v0  ;;  %775 = vmatpush3.bf16.msra.mxu1 %v866_v4  ;;  %v882_v30 = vld [vmem:[#allocation10 + $0x8] sm:$0xff]   ;;  %v883_v31 = vld [vmem:[#allocation10 + $0x10] sm:$0xff]   ;;  %v884_v32 = vld [vmem:[#allocation10 + $0x18] sm:$0xff]  }
  0x74   :  { %776 = vmatprep.subr.bf16.mxu1 %v1069_v0  ;;  %793 = vmatpush3.bf16.msra.mxu0 %v873_v11  ;;  %v885_v33 = vld [vmem:[#allocation10 + $0x20] sm:$0xff]   ;;  %v886_v34 = vld [vmem:[#allocation10 + $0x28] sm:$0xff]   ;;  %v683_v35 = vld [vmem:[%s1320_s4] ss:$0 sm:$0xff] }
  0x75   :  { %794 = vmatprep.subr.bf16.mxu0 %v1069_v0  ;;  %v887_v45 = vld [vmem:[#allocation10 + $0x30] sm:$0xff]   ;;  %v888_v46 = vld [vmem:[#allocation10 + $0x38] sm:$0xff]   ;;  %v889_v47 = vld [vmem:[#allocation11] sm:$0xff]  }
  0x76   :  { %v890_v48 = vld [vmem:[#allocation11 + $0x8] sm:$0xff]   ;;  %v891_v49 = vld [vmem:[#allocation11 + $0x10] sm:$0xff]   ;;  %v892_v50 = vld [vmem:[#allocation11 + $0x18] sm:$0xff]  }
  0x77   :  { %777 = vmatpush3.bf16.msra.mxu1 %v867_v5  ;;  %v893_v51 = vld [vmem:[#allocation11 + $0x20] sm:$0xff]   ;;  %v894_v52 = vld [vmem:[#allocation11 + $0x28] sm:$0xff]   ;;  %v692_v53 = vld [vmem:[%s1322_s6] ss:$0 sm:$0xff] }
  0x78   :  { %778 = vmatprep.subr.bf16.mxu1 %v1069_v0  ;;  %795 = vmatpush3.bf16.msra.mxu0 %v874_v12  ;;  %v895_v63 = vld [vmem:[#allocation11 + $0x30] sm:$0xff]   ;;  %v896_v1 = vld [vmem:[#allocation11 + $0x38] sm:$0xff]  }
  0x79   :  { %796 = vmatprep.subr.bf16.mxu0 %v1069_v0  ;;  %v701_v2 = vld [vmem:[%s1324_s8] ss:$0 sm:$0xff]  ;;  %s1029_s8 = scalar_lea.vmem %s665_s21, 128 }
  0x7a   :  { %p1030_p6 = scmp.ne.s32.totalorder %s665_s21, %s1029_s8  ;;  %p1035_p8 = scmp.lt.s32.totalorder %s1029_s8, %s1029_s8 }
  0x7b   :  { %779 = vmatpush3.bf16.msra.mxu1 %v868_v6 }
  0x7c   :  { %780 = vmatprep.subr.bf16.mxu1 %v1069_v0  ;;  %797 = vmatpush3.bf16.msra.mxu0 %v875_v13  ;;  %p1036_p9 = por %p1035_p8, %p1034_p7 }
  0x7d   :  { %798 = vmatprep.subr.bf16.mxu0 %v1069_v0 }
  0x7e   :  { %p1037_p10 = pnand %p1036_p9, %p1030_p6 }
  0x7f   :  { %781 = vmatpush3.bf16.msra.mxu1 %v869_v7 }
  0x80   :  { %782 = vmatprep.subr.bf16.mxu1 %v1069_v0  ;;  %799 = vmatpush3.bf16.msra.mxu0 %v876_v14 }
  0x81   :  { %800 = vmatprep.subr.bf16.mxu0 %v1069_v0 }
  0x83   :  { %783 = vmatpush3.bf16.msra.mxu1 %v870_v8 }
  0x84   :  { %784 = vmatprep.subr.bf16.mxu1 %v1069_v0  ;;  %801 = vmatpush3.bf16.msra.mxu0 %v877_v15 }
  0x85   :  { %802 = vmatprep.subr.bf16.mxu0 %v1069_v0 }
  0x87   :  { %785 = vmatpush3.bf16.msra.mxu1 %v871_v9 }
  0x88   :  { %786 = vmatprep.subr.bf16.mxu1 %v1069_v0  ;;  %803 = vmatpush3.bf16.msra.mxu0 %v878_v16 }
  0x89   :  { %804 = vmatprep.subr.bf16.mxu0 %v1069_v0 }
  0x8b   :  { %787 = vmatpush3.bf16.msra.mxu1 %v872_v10 }
  0x8c   :  { %812 = vmatprep.subr.bf16.mxu1 %v1069_v0  ;;  %805 = vmatpush3.bf16.msra.mxu0 %v879_v27 }
  0x8d   :  { %806 = vmatprep.subr.bf16.mxu0 %v1069_v0 }
  0x90   :  { %807 = vmatpush3.bf16.msra.mxu0 %v880_v28 }
  0x91   :  { %832 = vmatprep.subr.bf16.mxu0 %v1069_v0 }
 0x145   :  { %v182_v18 = vpop.f32.mrb[0].mxu0 }
 0x146   :  { %v183_v19 = vadd.f32 %v679_v17, %v182_v18  ;;  %v770_v20 = vpop.f32.mrb[1].mxu0 }
 0x147   :  { %v185_v21 = vpop.f32.mrb[2].mxu0 }
 0x148   :  { %v186_v22 = vadd.f32 %v679_v17, %v185_v21  ;;  %v771_v23 = vpop.f32.mrb[3].mxu0  ;;  %v189_v24 = vmax.f32 %v183_v19, 0.0 }
 0x14a   :  { %v190_v25 = vmax.f32 %v186_v22, 0.0 }
 0x14c   :  { %v191_v26 = vpack.c.bf16 %v190_v25, %v189_v24 }
 0x14e   :  { %789 = vmatmul.mubr.bf16.vlgmr.msra.gmra.mrb[0].mxu1 %v191_v26 }
 0x14f   :  { %828 = vmatprep.mubr.msk.bf16.mxu1 %vm1070_vm0, %v1069_v0  ;;  %813 = vmatpush3.bf16.msra.mxu1 %v881_v29 }
 0x150   :  { %814 = vmatprep.subr.bf16.mxu1 %v1069_v0 }
 0x153   :  { %815 = vmatpush3.bf16.msra.mxu1 %v882_v30 }
 0x154   :  { %816 = vmatprep.subr.bf16.mxu1 %v1069_v0 }
 0x157   :  { %817 = vmatpush3.bf16.msra.mxu1 %v883_v31 }
 0x158   :  { %818 = vmatprep.subr.bf16.mxu1 %v1069_v0 }
 0x15b   :  { %819 = vmatpush3.bf16.msra.mxu1 %v884_v32 }
 0x15c   :  { %820 = vmatprep.subr.bf16.mxu1 %v1069_v0 }
 0x15f   :  { %821 = vmatpush3.bf16.msra.mxu1 %v885_v33 }
 0x160   :  { %822 = vmatprep.subr.bf16.mxu1 %v1069_v0 }
 0x163   :  { %823 = vmatpush3.bf16.msra.mxu1 %v886_v34 }
 0x164   :  { %824 = vmatprep.subr.bf16.mxu1 %v1069_v0 }
 0x167   :  { %825 = vmatpush3.bf16.msra.mxu1 %v887_v45 }
 0x168   :  { %826 = vmatprep.subr.bf16.mxu1 %v1069_v0 }
 0x16b   :  { %827 = vmatpush3.bf16.msra.mxu1 %v888_v46 }
 0x221   :  { %v297_v36 = vpop.f32.mrb[0].mxu1 }
 0x222   :  { %v298_v37 = vadd.f32 %v683_v35, %v297_v36  ;;  %v790_v38 = vpop.f32.mrb[1].mxu1 }
 0x223   :  { %v300_v39 = vpop.f32.mrb[2].mxu1 }
 0x224   :  { %v301_v40 = vadd.f32 %v683_v35, %v300_v39  ;;  %v791_v41 = vpop.f32.mrb[3].mxu1  ;;  %v304_v42 = vmax.f32 %v298_v37, 0.0 }
 0x226   :  { %v305_v43 = vmax.f32 %v301_v40, 0.0 }
 0x228   :  { %v306_v44 = vpack.c.bf16 %v305_v43, %v304_v42 }
 0x22a   :  { %809 = vmatmul.mubr.bf16.vlgmr.msra.gmra.mrb[4].mxu0 %v306_v44 }
 0x22b   :  { %848 = vmatprep.mubr.msk.bf16.mxu0 %vm1070_vm0, %v1069_v0  ;;  %833 = vmatpush3.bf16.msra.mxu0 %v889_v47 }
 0x22c   :  { %834 = vmatprep.subr.bf16.mxu0 %v1069_v0 }
 0x22f   :  { %835 = vmatpush3.bf16.msra.mxu0 %v890_v48 }
 0x230   :  { %836 = vmatprep.subr.bf16.mxu0 %v1069_v0 }
 0x233   :  { %837 = vmatpush3.bf16.msra.mxu0 %v891_v49 }
 0x234   :  { %838 = vmatprep.subr.bf16.mxu0 %v1069_v0 }
 0x237   :  { %839 = vmatpush3.bf16.msra.mxu0 %v892_v50 }
 0x238   :  { %840 = vmatprep.subr.bf16.mxu0 %v1069_v0 }
 0x23b   :  { %841 = vmatpush3.bf16.msra.mxu0 %v893_v51 }
 0x23c   :  { %842 = vmatprep.subr.bf16.mxu0 %v1069_v0 }
 0x23f   :  { %843 = vmatpush3.bf16.msra.mxu0 %v894_v52 }
 0x240   :  { %844 = vmatprep.subr.bf16.mxu0 %v1069_v0 }
 0x243   :  { %845 = vmatpush3.bf16.msra.mxu0 %v895_v63 }
 0x244   :  { %846 = vmatprep.subr.bf16.mxu0 %v1069_v0  ;;  %v710_v0 = vld [vmem:[%s1326_s10] ss:$0 sm:$0xff] }
 0x247   :  { %847 = vmatpush3.bf16.msra.mxu0 %v896_v1 }
 0x2fd   :  { %v412_v54 = vpop.f32.mrb[4].mxu0 }
 0x2fe   :  { %v413_v55 = vadd.f32 %v692_v53, %v412_v54  ;;  %v810_v56 = vpop.f32.mrb[5].mxu0 }
 0x2ff   :  { %v415_v57 = vpop.f32.mrb[6].mxu0 }
 0x300   :  { %v416_v58 = vadd.f32 %v692_v53, %v415_v57  ;;  %v811_v59 = vpop.f32.mrb[7].mxu0  ;;  %v419_v60 = vmax.f32 %v413_v55, 0.0 }
 0x302   :  { %v420_v61 = vmax.f32 %v416_v58, 0.0 }
 0x304   :  { %v421_v62 = vpack.c.bf16 %v420_v61, %v419_v60 }
 0x306   :  { %829 = vmatmul.mubr.bf16.vlgmr.msra.gmra.mrb[4].mxu1 %v421_v62 }
 0x3d9   :  { %v527_v3 = vpop.f32.mrb[4].mxu1 }
 0x3da   :  { %v528_v4 = vadd.f32 %v701_v2, %v527_v3  ;;  %v830_v5 = vpop.f32.mrb[5].mxu1 }
 0x3db   :  { %v530_v6 = vpop.f32.mrb[6].mxu1 }
 0x3dc   :  { %v531_v7 = vadd.f32 %v701_v2, %v530_v6  ;;  %v831_v8 = vpop.f32.mrb[7].mxu1  ;;  %v534_v9 = vmax.f32 %v528_v4, 0.0 }
 0x3de   :  { %v535_v10 = vmax.f32 %v531_v7, 0.0 }
 0x3e0   :  { %v536_v11 = vpack.c.bf16 %v535_v10, %v534_v9 }
 0x3e2   :  { %849 = vmatmul.mubr.bf16.vlgmr.msra.gmra.mrb[8].mxu0 %v536_v11 }
 0x4b5   :  { %v642_v12 = vpop.f32.mrb[8].mxu0 }
 0x4b6   :  { %v850_v13 = vpop.f32.mrb[9].mxu0  ;;  %v643_v15 = vadd.f32 %v710_v0, %v642_v12 }
 0x4b7   :  { %v645_v14 = vpop.f32.mrb[10].mxu0 }
 0x4b8   :  { %v646_v16 = vadd.f32 %v710_v0, %v645_v14  ;;  %v851_v17 = vpop.f32.mrb[11].mxu0 }
 0x4ba   :  { %v726_v18 = vpack.c.bf16 %v646_v16, %v643_v15 }
 0x4bc   :  { %727 = vst [vmem:[#allocation13] sm:$0xff] %v726_v18  }
 0x4bd   :  { %1040 = shalt.err (!%p1037_p10)
}
 0x4be   :  { %s1041_s3 = scalar_lea.hbm %s1327_s11, 128 }
 0x4bf   :  { %p1042_p11 = scmp.ne.s32.totalorder %s1327_s11, %s1041_s3  ;;  %p1045_p12 = scmp.lt.u32.totalorder %s1041_s3, %s1327_s11 }
 0x4c1   :  { %p1047_p13 = pnand %p1045_p12, %p1042_p11 }
 0x4c3   :  { %1050 = shalt.err (!%p1047_p13)
}
 0x4c4   :  { %670 = dma.vmem_to_hbm [thread:$0]  %s665_s21, 128, %s1327_s11, [#allocation4], %s1063_s29, %s1063_s29, %s1064_s30  }
 0x4c5   :  { %1059 = dma.done.wait [#allocation4], 128  }
 0x4c6   :  { %1060 = vsyncadd [#allocation4], 4294967168 }
 0x4c7   :  { %674 = vsyncpa [#allocation3], 1 }
 0x4c8   :  { %675 = vsyncpa [#allocation6], 1 }
 0x4c9   :  { %676 = vsyncpa [#allocation9], 1 }
 0x4ca   :  { %677 = vsyncpa [#allocation12], 1 }
 0x4cb   :  { %678 = vsyncpa [#allocation4], 1 }

</bundles_post_ra>
